<compile_context>
chip_gen: v5e
topology: v5e:2x2
jax: 0.10.0
libtpu: 0.0.40
codegen_flags: <defaults>
</compile_context>

<pallas_src>
import jax
import jax.numpy as jnp
from jax import lax
from jax.experimental import pallas as pl
from jax.experimental.pallas import tpu as pltpu


def _cdiv(a: int, b: int) -> int:
    return -(-a // b)


def _round_up(a: int, b: int) -> int:
    return _cdiv(a, b) * b


def _rpq_kernel(x_ref, w_ref, out_ref):
    """One grid step: score tile_g packed rows against all codes, emit argmax.

    x_ref:   (tile_g, PACK*Din)   -- PACK original rows per packed 128-lane row
    w_ref:   (PACK*V, PACK*Din)   -- block-diagonal fused weight
    out_ref: (PACK, tile_g) int32 -- out[j, g] = code index of original row g*PACK + j
    """
    pack = out_ref.shape[0]
    # scores[v*pack + j, g] = <Wt[v], x_row[g*pack + j]>   (f32 accumulate on the MXU)
    scores = lax.dot_general(
        w_ref[...], x_ref[...],
        dimension_numbers=(((1,), (1,)), ((), ())),
        preferred_element_type=jnp.float32,
    )
    n_codes = scores.shape[0] // pack

    # Linear argmax fold over the codebook: 3 VPU ops per code on (pack, tile_g)
    # values; no cross-sublane reductions and the result already has the output
    # layout.  Strict '>' => first (lowest) index wins ties; NaNs never win.
    best = scores[:pack, :]
    idx = jnp.zeros(best.shape, jnp.int32)
    for v in range(1, n_codes):           # unrolled at trace time (V-1 iterations)
        cand = scores[v * pack:(v + 1) * pack, :]
        take = cand > best
        idx = jnp.where(take, jnp.int32(v), idx)
        best = jnp.maximum(best, cand)
    out_ref[...] = idx


def random_projection_quantize(x, P, CB, *, tile_rows=65536,
                               compute_dtype=jnp.bfloat16):
    """x: (B, T, input_dim) -> (B, T) int32 indices of the closest codebook entry.

    Assumes CB rows are unit-norm, as guaranteed by the module init
    (F.normalize(torch.randn(...))).  compute_dtype=jnp.bfloat16 (default) halves
    HBM traffic; use jnp.float32 for bit-faithful f32 scoring.
    """
    B, T, Din = x.shape
    V, D = CB.shape
    assert P.shape == (Din, D), (P.shape, (Din, D))
    if Din > 128:
        # TODO(synk): input_dim > 128 needs a K-tiled (multi-step contraction) variant.
        raise NotImplementedError("input_dim > 128 not supported by this kernel")
    N = B * T

    # Fused projection + codebook weight: argmax_v x . Wt[v]  ==  argmin distance.
    Wt = jnp.dot(CB.astype(jnp.float32), P.astype(jnp.float32).T)       # (V, Din)

    # Lane-dense packing: PACK original rows share one 128-lane packed row.
    d_pad = 1 << max(0, (Din - 1).bit_length())      # next power of two >= Din
    pack = 128 // d_pad                              # 8 for input_dim == 16
    lanes = pack * d_pad                             # == 128

    # Block-diagonal fused weight: W3[v*pack + j, j*d_pad + d] = Wt[v, d].
    Wt_p = Wt if d_pad == Din else jnp.pad(Wt, ((0, 0), (0, d_pad - Din)))
    eye = jnp.eye(pack, dtype=jnp.float32)
    W3 = (Wt_p[:, None, None, :] * eye[None, :, :, None]).reshape(V * pack, lanes)
    W3 = W3.astype(compute_dtype)

    # Row-tile selection: large enough to amortize the ~0.35 us per-grid-step
    # overhead; capped at 65536 rows so the per-step VMEM (bf16 x block x 2 buffers
    # + f32 (pack*V, tile_g) score buffer + int32 out block) stays ~14 MiB, well
    # under the explicit 32 MiB limit below; shrunk so the grid has >= 2 steps when
    # the data spans more than one minimal tile (lets v7x megacore split the grid).
    align = pack * 128                               # rows per minimal aligned tile
    tile_rows = max(align, min(int(tile_rows), 65536, _round_up(N, align)))
    tile_rows = _round_up(tile_rows, align)
    if N > align and _cdiv(N, tile_rows) < 2:
        tile_rows = _round_up(_cdiv(N, 2), align)
    n_pad = _round_up(N, tile_rows)
    num_tiles = n_pad // tile_rows
    tile_g = tile_rows // pack

    # Pad rows (and feature dim if needed), then pack `pack` rows per 128-lane row.
    # The compute_dtype cast fuses with this padding copy.  Padded rows score 0 for
    # every code, map to index 0, and are sliced off below.
    x2 = x.reshape(N, Din).astype(jnp.float32)
    if d_pad != Din:
        x2 = jnp.pad(x2, ((0, 0), (0, d_pad - Din)))
    if n_pad != N:
        x2 = jnp.pad(x2, ((0, n_pad - N), (0, 0)))
    xg = x2.reshape(n_pad // pack, lanes).astype(compute_dtype)

    out = pl.pallas_call(
        _rpq_kernel,
        out_shape=jax.ShapeDtypeStruct((pack, n_pad // pack), jnp.int32),
        grid=(num_tiles,),
        in_specs=[
            pl.BlockSpec((tile_g, lanes), lambda i: (i, 0)),      # x: streamed
            pl.BlockSpec((V * pack, lanes), lambda i: (0, 0)),    # W3: resident
        ],
        # Lane-dense int32 index block -> unmasked vector stores.
        out_specs=pl.BlockSpec((pack, tile_g), lambda i: (0, i)),
        compiler_params=pltpu.CompilerParams(
            dimension_semantics=("parallel",),
            vmem_limit_bytes=32 * 1024 * 1024,
        ),
    )(xg, W3)

    # out[j, g] = code of original row g*pack + j -> restore natural row order.
    # (transpose + slice + reshape fuse into one small int32 copy in XLA)
    return out.T.reshape(n_pad)[:N].reshape(B, T)


def _reference(x, P, CB):
    """Pure-JAX f32 reference matching the PyTorch forward."""
    proj = x.astype(jnp.float32) @ P.astype(jnp.float32)
    nrm = jnp.sqrt(jnp.sum(proj * proj, axis=-1, keepdims=True))
    xn = proj / jnp.maximum(nrm, 1e-12)                   # (B, T, D)
    diff = CB[None, :, None, :] - xn[:, None, :, :]       # (B, V, T, D)
    dist = jnp.sqrt(jnp.sum(diff * diff, axis=-1))        # (B, V, T)
    return jnp.argmin(dist, axis=1).astype(jnp.int32)     # (B, T)


def _validate(out, ref, x, P, CB, *, gap_tol, min_match):
    """out must equal ref except at near-ties (picked code within gap_tol of best)."""
    assert out.shape == ref.shape, (out.shape, ref.shape)
    assert out.dtype == jnp.int32, out.dtype
    assert bool(jnp.all((out >= 0) & (out < CB.shape[0]))), "index out of range"
    proj = x.astype(jnp.float32) @ P.astype(jnp.float32)
    s = jnp.einsum("btd,vd->btv", proj, CB.astype(jnp.float32))
    best = jnp.max(s, axis=-1)
    spread = best - jnp.min(s, axis=-1)
    picked = jnp.take_along_axis(s, out[..., None], axis=-1)[..., 0]
    near_tie_ok = (best - picked) <= gap_tol * jnp.maximum(spread, 1.0)
    assert bool(jnp.all(jnp.where(out == ref, True, near_tie_ok))), \
        "kernel picked a code that is not the nearest (beyond rounding tolerance)"
    match = float(jnp.mean((out == ref).astype(jnp.float32)))
    assert match >= min_match, f"match fraction {match:.4f} < {min_match}"


if __name__ == "__main__":
    # Module config matching the docstring example: RandomProjectionQuantizer(16, 16, 32)
    input_dim, cb_dim, cb_vocab = 16, 16, 32

    key = jax.random.PRNGKey(0)
    k_p, k_cb, k_x1, k_x2 = jax.random.split(key, 4)

    # Deterministic parameter init mirroring the PyTorch __init__:
    #   P  = xavier_uniform_ on (input_dim, cb_dim)
    #   CB = F.normalize(randn(cb_vocab, cb_dim))  -> unit-norm rows
    bound = float(jnp.sqrt(6.0 / (input_dim + cb_dim)))
    P = jax.random.uniform(k_p, (input_dim, cb_dim), jnp.float32, -bound, bound)
    CB_raw = jax.random.normal(k_cb, (cb_vocab, cb_dim), jnp.float32)
    CB = CB_raw / jnp.maximum(
        jnp.sqrt(jnp.sum(CB_raw * CB_raw, axis=-1, keepdims=True)), 1e-12)

    # Test 1: docstring-style small input, f32 scoring, single padded tile.
    x1 = jax.random.uniform(k_x1, (2, 12, input_dim), jnp.float32)
    out1 = jax.block_until_ready(
        random_projection_quantize(x1, P, CB, compute_dtype=jnp.float32))
    _validate(out1, _reference(x1, P, CB), x1, P, CB, gap_tol=1e-3, min_match=0.999)

    # Test 2: multi-tile grid with a ragged tail, f32 scoring (N=2400 -> 3 tiles).
    x2 = jax.random.uniform(k_x2, (4, 600, input_dim), jnp.float32)
    out2 = jax.block_until_ready(
        random_projection_quantize(x2, P, CB, tile_rows=1024,
                                   compute_dtype=jnp.float32))
    _validate(out2, _reference(x2, P, CB), x2, P, CB, gap_tol=1e-3, min_match=0.999)

    # Test 3: default fast path (bf16 streaming, auto tile size, >= 2 grid steps).
    # bf16 may flip genuinely near-tied codes vs. the f32 reference; the gap check
    # verifies every pick is still (numerically) a nearest code.
    out3 = jax.block_until_ready(random_projection_quantize(x2, P, CB))
    _validate(out3, _reference(x2, P, CB), x2, P, CB, gap_tol=6e-2, min_match=0.9)

    print("KERNEL_OK")
</pallas_src>

<mosaic_0001>
module attributes {stable_mosaic.version = 11 : i64} {
  func.func @_rpq_kernel(%arg0: i32, %arg1: memref<128x128xf32, #tpu.memory_space<vmem>>, %arg2: memref<256x128xf32, #tpu.memory_space<vmem>>, %arg3: memref<8x128xi32, #tpu.memory_space<vmem>>) attributes {dimension_semantics = [#tpu.dimension_semantics<parallel>], iteration_bounds = array<i64: 1>, scalar_prefetch = 0 : i64, scratch_operands = 0 : i64, tpu.core_type = #tpu.core_type<tc>, window_params = [{transform_indices = @transform_0, window_bounds = array<i64: 128, 128>}, {pipeline_mode = #tpu.pipeline_mode<synchronous>, transform_indices = @transform_1, window_bounds = array<i64: 256, 128>}, {transform_indices = @transform_2, window_bounds = array<i64: 8, 128>}]} {
    %c0 = arith.constant 0 : index
    %c0_0 = arith.constant 0 : index
    %0 = vector.load %arg2[%c0, %c0_0] : memref<256x128xf32, #tpu.memory_space<vmem>>, vector<256x128xf32>
    %c0_1 = arith.constant 0 : index
    %c0_2 = arith.constant 0 : index
    %1 = vector.load %arg1[%c0_1, %c0_2] : memref<128x128xf32, #tpu.memory_space<vmem>>, vector<128x128xf32>
    %cst = arith.constant dense<0.000000e+00> : vector<256x128xf32>
    %2 = tpu.matmul %0, %1, %cst {dimension_numbers = #tpu.dot_dimension_numbers<[1], [1], [0], [0], [0, 0, 1, 0], [], []>} : vector<256x128xf32>, vector<128x128xf32>, vector<256x128xf32> -> vector<256x128xf32>
    %3 = vector.extract_strided_slice %2 {offsets = [0, 0], sizes = [8, 128], strides = [1, 1]} : vector<256x128xf32> to vector<8x128xf32>
    %c0_i32 = arith.constant 0 : i32
    %4 = vector.broadcast %c0_i32 : i32 to vector<8x128xi32>
    %5 = vector.extract_strided_slice %2 {offsets = [8, 0], sizes = [8, 128], strides = [1, 1]} : vector<256x128xf32> to vector<8x128xf32>
    %6 = arith.cmpf ogt, %5, %3 : vector<8x128xf32>
    %c1_i32 = arith.constant 1 : i32
    %7 = vector.broadcast %c1_i32 : i32 to vector<8x128xi32>
    %8 = arith.select %6, %7, %4 : vector<8x128xi1>, vector<8x128xi32>
    %9 = arith.maximumf %3, %5 : vector<8x128xf32>
    %10 = vector.extract_strided_slice %2 {offsets = [16, 0], sizes = [8, 128], strides = [1, 1]} : vector<256x128xf32> to vector<8x128xf32>
    %11 = arith.cmpf ogt, %10, %9 : vector<8x128xf32>
    %c2_i32 = arith.constant 2 : i32
    %12 = vector.broadcast %c2_i32 : i32 to vector<8x128xi32>
    %13 = arith.select %11, %12, %8 : vector<8x128xi1>, vector<8x128xi32>
    %14 = arith.maximumf %9, %10 : vector<8x128xf32>
    %15 = vector.extract_strided_slice %2 {offsets = [24, 0], sizes = [8, 128], strides = [1, 1]} : vector<256x128xf32> to vector<8x128xf32>
    %16 = arith.cmpf ogt, %15, %14 : vector<8x128xf32>
    %c3_i32 = arith.constant 3 : i32
    %17 = vector.broadcast %c3_i32 : i32 to vector<8x128xi32>
    %18 = arith.select %16, %17, %13 : vector<8x128xi1>, vector<8x128xi32>
    %19 = arith.maximumf %14, %15 : vector<8x128xf32>
    %20 = vector.extract_strided_slice %2 {offsets = [32, 0], sizes = [8, 128], strides = [1, 1]} : vector<256x128xf32> to vector<8x128xf32>
    %21 = arith.cmpf ogt, %20, %19 : vector<8x128xf32>
    %c4_i32 = arith.constant 4 : i32
    %22 = vector.broadcast %c4_i32 : i32 to vector<8x128xi32>
    %23 = arith.select %21, %22, %18 : vector<8x128xi1>, vector<8x128xi32>
    %24 = arith.maximumf %19, %20 : vector<8x128xf32>
    %25 = vector.extract_strided_slice %2 {offsets = [40, 0], sizes = [8, 128], strides = [1, 1]} : vector<256x128xf32> to vector<8x128xf32>
    %26 = arith.cmpf ogt, %25, %24 : vector<8x128xf32>
    %c5_i32 = arith.constant 5 : i32
    %27 = vector.broadcast %c5_i32 : i32 to vector<8x128xi32>
    %28 = arith.select %26, %27, %23 : vector<8x128xi1>, vector<8x128xi32>
    %29 = arith.maximumf %24, %25 : vector<8x128xf32>
    %30 = vector.extract_strided_slice %2 {offsets = [48, 0], sizes = [8, 128], strides = [1, 1]} : vector<256x128xf32> to vector<8x128xf32>
    %31 = arith.cmpf ogt, %30, %29 : vector<8x128xf32>
    %c6_i32 = arith.constant 6 : i32
    %32 = vector.broadcast %c6_i32 : i32 to vector<8x128xi32>
    %33 = arith.select %31, %32, %28 : vector<8x128xi1>, vector<8x128xi32>
    %34 = arith.maximumf %29, %30 : vector<8x128xf32>
    %35 = vector.extract_strided_slice %2 {offsets = [56, 0], sizes = [8, 128], strides = [1, 1]} : vector<256x128xf32> to vector<8x128xf32>
    %36 = arith.cmpf ogt, %35, %34 : vector<8x128xf32>
    %c7_i32 = arith.constant 7 : i32
    %37 = vector.broadcast %c7_i32 : i32 to vector<8x128xi32>
    %38 = arith.select %36, %37, %33 : vector<8x128xi1>, vector<8x128xi32>
    %39 = arith.maximumf %34, %35 : vector<8x128xf32>
    %40 = vector.extract_strided_slice %2 {offsets = [64, 0], sizes = [8, 128], strides = [1, 1]} : vector<256x128xf32> to vector<8x128xf32>
    %41 = arith.cmpf ogt, %40, %39 : vector<8x128xf32>
    %c8_i32 = arith.constant 8 : i32
    %42 = vector.broadcast %c8_i32 : i32 to vector<8x128xi32>
    %43 = arith.select %41, %42, %38 : vector<8x128xi1>, vector<8x128xi32>
    %44 = arith.maximumf %39, %40 : vector<8x128xf32>
    %45 = vector.extract_strided_slice %2 {offsets = [72, 0], sizes = [8, 128], strides = [1, 1]} : vector<256x128xf32> to vector<8x128xf32>
    %46 = arith.cmpf ogt, %45, %44 : vector<8x128xf32>
    %c9_i32 = arith.constant 9 : i32
    %47 = vector.broadcast %c9_i32 : i32 to vector<8x128xi32>
    %48 = arith.select %46, %47, %43 : vector<8x128xi1>, vector<8x128xi32>
    %49 = arith.maximumf %44, %45 : vector<8x128xf32>
    %50 = vector.extract_strided_slice %2 {offsets = [80, 0], sizes = [8, 128], strides = [1, 1]} : vector<256x128xf32> to vector<8x128xf32>
    %51 = arith.cmpf ogt, %50, %49 : vector<8x128xf32>
    %c10_i32 = arith.constant 10 : i32
    %52 = vector.broadcast %c10_i32 : i32 to vector<8x128xi32>
    %53 = arith.select %51, %52, %48 : vector<8x128xi1>, vector<8x128xi32>
    %54 = arith.maximumf %49, %50 : vector<8x128xf32>
    %55 = vector.extract_strided_slice %2 {offsets = [88, 0], sizes = [8, 128], strides = [1, 1]} : vector<256x128xf32> to vector<8x128xf32>
    %56 = arith.cmpf ogt, %55, %54 : vector<8x128xf32>
    %c11_i32 = arith.constant 11 : i32
    %57 = vector.broadcast %c11_i32 : i32 to vector<8x128xi32>
    %58 = arith.select %56, %57, %53 : vector<8x128xi1>, vector<8x128xi32>
    %59 = arith.maximumf %54, %55 : vector<8x128xf32>
    %60 = vector.extract_strided_slice %2 {offsets = [96, 0], sizes = [8, 128], strides = [1, 1]} : vector<256x128xf32> to vector<8x128xf32>
    %61 = arith.cmpf ogt, %60, %59 : vector<8x128xf32>
    %c12_i32 = arith.constant 12 : i32
    %62 = vector.broadcast %c12_i32 : i32 to vector<8x128xi32>
    %63 = arith.select %61, %62, %58 : vector<8x128xi1>, vector<8x128xi32>
    %64 = arith.maximumf %59, %60 : vector<8x128xf32>
    %65 = vector.extract_strided_slice %2 {offsets = [104, 0], sizes = [8, 128], strides = [1, 1]} : vector<256x128xf32> to vector<8x128xf32>
    %66 = arith.cmpf ogt, %65, %64 : vector<8x128xf32>
    %c13_i32 = arith.constant 13 : i32
    %67 = vector.broadcast %c13_i32 : i32 to vector<8x128xi32>
    %68 = arith.select %66, %67, %63 : vector<8x128xi1>, vector<8x128xi32>
    %69 = arith.maximumf %64, %65 : vector<8x128xf32>
    %70 = vector.extract_strided_slice %2 {offsets = [112, 0], sizes = [8, 128], strides = [1, 1]} : vector<256x128xf32> to vector<8x128xf32>
    %71 = arith.cmpf ogt, %70, %69 : vector<8x128xf32>
    %c14_i32 = arith.constant 14 : i32
    %72 = vector.broadcast %c14_i32 : i32 to vector<8x128xi32>
    %73 = arith.select %71, %72, %68 : vector<8x128xi1>, vector<8x128xi32>
    %74 = arith.maximumf %69, %70 : vector<8x128xf32>
    %75 = vector.extract_strided_slice %2 {offsets = [120, 0], sizes = [8, 128], strides = [1, 1]} : vector<256x128xf32> to vector<8x128xf32>
    %76 = arith.cmpf ogt, %75, %74 : vector<8x128xf32>
    %c15_i32 = arith.constant 15 : i32
    %77 = vector.broadcast %c15_i32 : i32 to vector<8x128xi32>
    %78 = arith.select %76, %77, %73 : vector<8x128xi1>, vector<8x128xi32>
    %79 = arith.maximumf %74, %75 : vector<8x128xf32>
    %80 = vector.extract_strided_slice %2 {offsets = [128, 0], sizes = [8, 128], strides = [1, 1]} : vector<256x128xf32> to vector<8x128xf32>
    %81 = arith.cmpf ogt, %80, %79 : vector<8x128xf32>
    %c16_i32 = arith.constant 16 : i32
    %82 = vector.broadcast %c16_i32 : i32 to vector<8x128xi32>
    %83 = arith.select %81, %82, %78 : vector<8x128xi1>, vector<8x128xi32>
    %84 = arith.maximumf %79, %80 : vector<8x128xf32>
    %85 = vector.extract_strided_slice %2 {offsets = [136, 0], sizes = [8, 128], strides = [1, 1]} : vector<256x128xf32> to vector<8x128xf32>
    %86 = arith.cmpf ogt, %85, %84 : vector<8x128xf32>
    %c17_i32 = arith.constant 17 : i32
    %87 = vector.broadcast %c17_i32 : i32 to vector<8x128xi32>
    %88 = arith.select %86, %87, %83 : vector<8x128xi1>, vector<8x128xi32>
    %89 = arith.maximumf %84, %85 : vector<8x128xf32>
    %90 = vector.extract_strided_slice %2 {offsets = [144, 0], sizes = [8, 128], strides = [1, 1]} : vector<256x128xf32> to vector<8x128xf32>
    %91 = arith.cmpf ogt, %90, %89 : vector<8x128xf32>
    %c18_i32 = arith.constant 18 : i32
    %92 = vector.broadcast %c18_i32 : i32 to vector<8x128xi32>
    %93 = arith.select %91, %92, %88 : vector<8x128xi1>, vector<8x128xi32>
    %94 = arith.maximumf %89, %90 : vector<8x128xf32>
    %95 = vector.extract_strided_slice %2 {offsets = [152, 0], sizes = [8, 128], strides = [1, 1]} : vector<256x128xf32> to vector<8x128xf32>
    %96 = arith.cmpf ogt, %95, %94 : vector<8x128xf32>
    %c19_i32 = arith.constant 19 : i32
    %97 = vector.broadcast %c19_i32 : i32 to vector<8x128xi32>
    %98 = arith.select %96, %97, %93 : vector<8x128xi1>, vector<8x128xi32>
    %99 = arith.maximumf %94, %95 : vector<8x128xf32>
    %100 = vector.extract_strided_slice %2 {offsets = [160, 0], sizes = [8, 128], strides = [1, 1]} : vector<256x128xf32> to vector<8x128xf32>
    %101 = arith.cmpf ogt, %100, %99 : vector<8x128xf32>
    %c20_i32 = arith.constant 20 : i32
    %102 = vector.broadcast %c20_i32 : i32 to vector<8x128xi32>
    %103 = arith.select %101, %102, %98 : vector<8x128xi1>, vector<8x128xi32>
    %104 = arith.maximumf %99, %100 : vector<8x128xf32>
    %105 = vector.extract_strided_slice %2 {offsets = [168, 0], sizes = [8, 128], strides = [1, 1]} : vector<256x128xf32> to vector<8x128xf32>
    %106 = arith.cmpf ogt, %105, %104 : vector<8x128xf32>
    %c21_i32 = arith.constant 21 : i32
    %107 = vector.broadcast %c21_i32 : i32 to vector<8x128xi32>
    %108 = arith.select %106, %107, %103 : vector<8x128xi1>, vector<8x128xi32>
    %109 = arith.maximumf %104, %105 : vector<8x128xf32>
    %110 = vector.extract_strided_slice %2 {offsets = [176, 0], sizes = [8, 128], strides = [1, 1]} : vector<256x128xf32> to vector<8x128xf32>
    %111 = arith.cmpf ogt, %110, %109 : vector<8x128xf32>
    %c22_i32 = arith.constant 22 : i32
    %112 = vector.broadcast %c22_i32 : i32 to vector<8x128xi32>
    %113 = arith.select %111, %112, %108 : vector<8x128xi1>, vector<8x128xi32>
    %114 = arith.maximumf %109, %110 : vector<8x128xf32>
    %115 = vector.extract_strided_slice %2 {offsets = [184, 0], sizes = [8, 128], strides = [1, 1]} : vector<256x128xf32> to vector<8x128xf32>
    %116 = arith.cmpf ogt, %115, %114 : vector<8x128xf32>
    %c23_i32 = arith.constant 23 : i32
    %117 = vector.broadcast %c23_i32 : i32 to vector<8x128xi32>
    %118 = arith.select %116, %117, %113 : vector<8x128xi1>, vector<8x128xi32>
    %119 = arith.maximumf %114, %115 : vector<8x128xf32>
    %120 = vector.extract_strided_slice %2 {offsets = [192, 0], sizes = [8, 128], strides = [1, 1]} : vector<256x128xf32> to vector<8x128xf32>
    %121 = arith.cmpf ogt, %120, %119 : vector<8x128xf32>
    %c24_i32 = arith.constant 24 : i32
    %122 = vector.broadcast %c24_i32 : i32 to vector<8x128xi32>
    %123 = arith.select %121, %122, %118 : vector<8x128xi1>, vector<8x128xi32>
    %124 = arith.maximumf %119, %120 : vector<8x128xf32>
    %125 = vector.extract_strided_slice %2 {offsets = [200, 0], sizes = [8, 128], strides = [1, 1]} : vector<256x128xf32> to vector<8x128xf32>
    %126 = arith.cmpf ogt, %125, %124 : vector<8x128xf32>
    %c25_i32 = arith.constant 25 : i32
    %127 = vector.broadcast %c25_i32 : i32 to vector<8x128xi32>
    %128 = arith.select %126, %127, %123 : vector<8x128xi1>, vector<8x128xi32>
    %129 = arith.maximumf %124, %125 : vector<8x128xf32>
    %130 = vector.extract_strided_slice %2 {offsets = [208, 0], sizes = [8, 128], strides = [1, 1]} : vector<256x128xf32> to vector<8x128xf32>
    %131 = arith.cmpf ogt, %130, %129 : vector<8x128xf32>
    %c26_i32 = arith.constant 26 : i32
    %132 = vector.broadcast %c26_i32 : i32 to vector<8x128xi32>
    %133 = arith.select %131, %132, %128 : vector<8x128xi1>, vector<8x128xi32>
    %134 = arith.maximumf %129, %130 : vector<8x128xf32>
    %135 = vector.extract_strided_slice %2 {offsets = [216, 0], sizes = [8, 128], strides = [1, 1]} : vector<256x128xf32> to vector<8x128xf32>
    %136 = arith.cmpf ogt, %135, %134 : vector<8x128xf32>
    %c27_i32 = arith.constant 27 : i32
    %137 = vector.broadcast %c27_i32 : i32 to vector<8x128xi32>
    %138 = arith.select %136, %137, %133 : vector<8x128xi1>, vector<8x128xi32>
    %139 = arith.maximumf %134, %135 : vector<8x128xf32>
    %140 = vector.extract_strided_slice %2 {offsets = [224, 0], sizes = [8, 128], strides = [1, 1]} : vector<256x128xf32> to vector<8x128xf32>
    %141 = arith.cmpf ogt, %140, %139 : vector<8x128xf32>
    %c28_i32 = arith.constant 28 : i32
    %142 = vector.broadcast %c28_i32 : i32 to vector<8x128xi32>
    %143 = arith.select %141, %142, %138 : vector<8x128xi1>, vector<8x128xi32>
    %144 = arith.maximumf %139, %140 : vector<8x128xf32>
    %145 = vector.extract_strided_slice %2 {offsets = [232, 0], sizes = [8, 128], strides = [1, 1]} : vector<256x128xf32> to vector<8x128xf32>
    %146 = arith.cmpf ogt, %145, %144 : vector<8x128xf32>
    %c29_i32 = arith.constant 29 : i32
    %147 = vector.broadcast %c29_i32 : i32 to vector<8x128xi32>
    %148 = arith.select %146, %147, %143 : vector<8x128xi1>, vector<8x128xi32>
    %149 = arith.maximumf %144, %145 : vector<8x128xf32>
    %150 = vector.extract_strided_slice %2 {offsets = [240, 0], sizes = [8, 128], strides = [1, 1]} : vector<256x128xf32> to vector<8x128xf32>
    %151 = arith.cmpf ogt, %150, %149 : vector<8x128xf32>
    %c30_i32 = arith.constant 30 : i32
    %152 = vector.broadcast %c30_i32 : i32 to vector<8x128xi32>
    %153 = arith.select %151, %152, %148 : vector<8x128xi1>, vector<8x128xi32>
    %154 = arith.maximumf %149, %150 : vector<8x128xf32>
    %155 = vector.extract_strided_slice %2 {offsets = [248, 0], sizes = [8, 128], strides = [1, 1]} : vector<256x128xf32> to vector<8x128xf32>
    %156 = arith.cmpf ogt, %155, %154 : vector<8x128xf32>
    %c31_i32 = arith.constant 31 : i32
    %157 = vector.broadcast %c31_i32 : i32 to vector<8x128xi32>
    %158 = arith.select %156, %157, %153 : vector<8x128xi1>, vector<8x128xi32>
    %c0_3 = arith.constant 0 : index
    %c0_4 = arith.constant 0 : index
    %159 = vector.load %arg3[%c0_3, %c0_4] : memref<8x128xi32, #tpu.memory_space<vmem>>, vector<8x128xi32>
    tpu.vector_store %arg3[%c0_3, %c0_4], %158 {strides = array<i32>} : memref<8x128xi32, #tpu.memory_space<vmem>>, vector<8x128xi32>,
    return
  }
  func.func @transform_0(%arg0: i32) -> (i32, i32) {
    %c0_i32 = arith.constant 0 : i32
    %c0_i32_0 = arith.constant 0 : i32
    return %arg0, %c0_i32 : i32, i32
  }
  func.func @transform_1(%arg0: i32) -> (i32, i32) {
    %c0_i32 = arith.constant 0 : i32
    %c0_i32_0 = arith.constant 0 : i32
    %c0_i32_1 = arith.constant 0 : i32
    return %c0_i32, %c0_i32_0 : i32, i32
  }
  func.func @transform_2(%arg0: i32) -> (i32, i32) {
    %c0_i32 = arith.constant 0 : i32
    %c0_i32_0 = arith.constant 0 : i32
    return %c0_i32, %arg0 : i32, i32
  }
}

</mosaic_0001>

<bundles_post_ra>
// kernel: tpu_custom_call.1
= control target key start
LH: loop header
LB: loop body
LE: loop exit
PB: predicated region body
PF: predicated region fallthrough
CT: control target
= control target key end

     0   :  { %7 = vsyncpa [#allocation3], 0  ;;  %s507_s0 = inlined_call_operand.hbm [shape: f32[128,128], index: 0, kind: input, shape index: {}]   ;;  %s508_s1 = inlined_call_operand.hbm [shape: f32[256,128], index: 1, kind: input, shape index: {}]   ;;  %s509_s2 = inlined_call_operand.hbm [shape: s32[8,128], index: 2, kind: output, shape index: {}]  }
   0x1   :  { %8 = vsyncpa [#allocation6], 0 }
   0x2   :  { %9 = vsyncpa [#allocation4], 0  ;;  %s14_s11 = sshll.u32 %s507_s0, 4  ;;  %s448_s12 = smov [#allocation2]   ;;  %s15_s11 = int_to_ptr.hbm [resolvable:$true] %s14_s11 }
   0x3   :  { %s16_s13 = sshll.u32 %s448_s12, 4  ;;  %s27_s16 = sshll.u32 %s508_s1, 4  ;;  %s17_s13 = int_to_ptr.vmem [resolvable:$true] %s16_s13  ;;  %s28_s16 = int_to_ptr.hbm [resolvable:$true] %s27_s16 }
   0x4   :  { %s449_s17 = smov 128   ;;  %s450_s18 = smov 8  }
   0x5   :  { %22 = dma.hbm_to_vmem [thread:$0]  %s15_s11, 2048, %s17_s13, [#allocation3], %s449_s17, %s449_s17, %s450_s18  }
   0x6   :  { %s451_s19 = smov [#allocation5]  }
   0x7   :  { %s29_s20 = sshll.u32 %s451_s19, 4  ;;  %s30_s20 = int_to_ptr.vmem [resolvable:$true] %s29_s20 }
   0x8   :  { %35 = dma.hbm_to_vmem [thread:$0]  %s28_s16, 4096, %s30_s20, [#allocation6], %s449_s17, %s449_s17, %s450_s18  }
   0x9   :  { %442 = dma.done.wait [#allocation3], 2048  }
   0xa   :  { %443 = vsyncadd [#allocation3], 4294965248 }
   0xb   :  { %444 = dma.done.wait [#allocation6], 4096  }
   0xc   :  { %445 = vsyncadd [#allocation6], 4294963200  ;;  %v91_v0 = vld [vmem:[#allocation2 + $0x78] sm:$0xff]  ;;  %v90_v1 = vld [vmem:[#allocation2 + $0x70] sm:$0xff]  ;;  %s453_s0 = smov [#allocation7]   ;;  %s305_s23 = sshll.u32 %s509_s2, 4  ;;  %s306_s23 = int_to_ptr.hbm [resolvable:$true] %s305_s23 }
   0xd   :  { %92 = vmatpush.xpose.msra.mxu0 %v91_v0  ;;  %316 = vmatpush.xpose.msra.mxu1 %v91_v0  ;;  %v89_v2 = vld [vmem:[#allocation2 + $0x68] sm:$0xff]  ;;  %v88_v3 = vld [vmem:[#allocation2 + $0x60] sm:$0xff]  ;;  %v87_v4 = vld [vmem:[#allocation2 + $0x58] sm:$0xff]  ;;  %s303_s1 = sshll.u32 %s453_s0, 4  ;;  %s304_s1 = int_to_ptr.vmem [resolvable:$true] %s303_s1 }
   0xe   :  { %317 = vmatpush.xpose.msra.mxu2 %v91_v0  ;;  %318 = vmatpush.xpose.msra.mxu3 %v91_v0  ;;  %v86_v5 = vld [vmem:[#allocation2 + $0x50] sm:$0xff]  ;;  %v85_v6 = vld [vmem:[#allocation2 + $0x48] sm:$0xff]  ;;  %v84_v7 = vld [vmem:[#allocation2 + $0x40] sm:$0xff] }
   0xf   :  { %v83_v8 = vld [vmem:[#allocation2 + $0x38] sm:$0xff]  ;;  %v82_v9 = vld [vmem:[#allocation2 + $0x30] sm:$0xff]  ;;  %v81_v10 = vld [vmem:[#allocation2 + $0x28] sm:$0xff] }
  0x10   :  { %v80_v11 = vld [vmem:[#allocation2 + $0x20] sm:$0xff]  ;;  %v79_v12 = vld [vmem:[#allocation2 + $0x18] sm:$0xff]  ;;  %v78_v13 = vld [vmem:[#allocation2 + $0x10] sm:$0xff] }
  0x11   :  { %93 = vmatpush.xpose.msra.mxu0 %v90_v1  ;;  %319 = vmatpush.xpose.msra.mxu1 %v90_v1  ;;  %v77_v14 = vld [vmem:[#allocation2 + $0x8] sm:$0xff]  ;;  %v76_v15 = vld [vmem:[#allocation2] sm:$0xff]  ;;  %v46_v23 = vld [vmem:[#allocation5 + $0x10] sm:$0xff] }
  0x12   :  { %320 = vmatpush.xpose.msra.mxu2 %v90_v1  ;;  %321 = vmatpush.xpose.msra.mxu3 %v90_v1  ;;  %v44_v16 = vld [vmem:[#allocation5] sm:$0xff]  ;;  %v45_v19 = vld [vmem:[#allocation5 + $0x8] sm:$0xff]  ;;  %v54_v24 = vld [vmem:[#allocation5 + $0x50] sm:$0xff] }
  0x13   :  { %v52_v17 = vld [vmem:[#allocation5 + $0x40] sm:$0xff]  ;;  %v53_v20 = vld [vmem:[#allocation5 + $0x48] sm:$0xff]  ;;  %v62_v25 = vld [vmem:[#allocation5 + $0x90] sm:$0xff] }
  0x14   :  { %v60_v18 = vld [vmem:[#allocation5 + $0x80] sm:$0xff]  ;;  %v61_v21 = vld [vmem:[#allocation5 + $0x88] sm:$0xff]  ;;  %v47_v27 = vld [vmem:[#allocation5 + $0x18] sm:$0xff] }
  0x15   :  { %94 = vmatpush.xpose.msra.mxu0 %v89_v2  ;;  %322 = vmatpush.xpose.msra.mxu1 %v89_v2  ;;  %v68_v22 = vld [vmem:[#allocation5 + $0xc0] sm:$0xff]  ;;  %v69_v26 = vld [vmem:[#allocation5 + $0xc8] sm:$0xff]  ;;  %v55_v28 = vld [vmem:[#allocation5 + $0x58] sm:$0xff] }
  0x16   :  { %323 = vmatpush.xpose.msra.mxu2 %v89_v2  ;;  %324 = vmatpush.xpose.msra.mxu3 %v89_v2  ;;  %v63_v29 = vld [vmem:[#allocation5 + $0x98] sm:$0xff]  ;;  %v70_v30 = vld [vmem:[#allocation5 + $0xd0] sm:$0xff]  ;;  %v48_v31 = vld [vmem:[#allocation5 + $0x20] sm:$0xff] }
  0x17   :  { %v56_v32 = vld [vmem:[#allocation5 + $0x60] sm:$0xff]  ;;  %v71_v34 = vld [vmem:[#allocation5 + $0xd8] sm:$0xff]  ;;  %v49_v35 = vld [vmem:[#allocation5 + $0x28] sm:$0xff] }
  0x18   :  { %v64_v33 = vld [vmem:[#allocation5 + $0xa0] sm:$0xff]  ;;  %v57_v36 = vld [vmem:[#allocation5 + $0x68] sm:$0xff]  ;;  %v50_v39 = vld [vmem:[#allocation5 + $0x30] sm:$0xff] }
  0x19   :  { %95 = vmatpush.xpose.msra.mxu0 %v88_v3  ;;  %325 = vmatpush.xpose.msra.mxu1 %v88_v3  ;;  %v65_v37 = vld [vmem:[#allocation5 + $0xa8] sm:$0xff]  ;;  %v72_v38 = vld [vmem:[#allocation5 + $0xe0] sm:$0xff]  ;;  %v58_v40 = vld [vmem:[#allocation5 + $0x70] sm:$0xff] }
  0x1a   :  { %326 = vmatpush.xpose.msra.mxu2 %v88_v3  ;;  %327 = vmatpush.xpose.msra.mxu3 %v88_v3  ;;  %v66_v41 = vld [vmem:[#allocation5 + $0xb0] sm:$0xff]  ;;  %v73_v42 = vld [vmem:[#allocation5 + $0xe8] sm:$0xff]  ;;  %v51_v43 = vld [vmem:[#allocation5 + $0x38] sm:$0xff] }
  0x1b   :  { %v59_v44 = vld [vmem:[#allocation5 + $0x78] sm:$0xff]  ;;  %v74_v46 = vld [vmem:[#allocation5 + $0xf0] sm:$0xff] }
  0x1c   :  { %v67_v45 = vld [vmem:[#allocation5 + $0xb8] sm:$0xff] }
  0x1d   :  { %96 = vmatpush.xpose.msra.mxu0 %v87_v4  ;;  %328 = vmatpush.xpose.msra.mxu1 %v87_v4  ;;  %v75_v47 = vld [vmem:[#allocation5 + $0xf8] sm:$0xff] }
  0x1e   :  { %329 = vmatpush.xpose.msra.mxu2 %v87_v4  ;;  %330 = vmatpush.xpose.msra.mxu3 %v87_v4 }
  0x21   :  { %97 = vmatpush.xpose.msra.mxu0 %v86_v5  ;;  %331 = vmatpush.xpose.msra.mxu1 %v86_v5 }
  0x22   :  { %332 = vmatpush.xpose.msra.mxu2 %v86_v5  ;;  %333 = vmatpush.xpose.msra.mxu3 %v86_v5 }
  0x25   :  { %98 = vmatpush.xpose.msra.mxu0 %v85_v6  ;;  %334 = vmatpush.xpose.msra.mxu1 %v85_v6 }
  0x26   :  { %335 = vmatpush.xpose.msra.mxu2 %v85_v6  ;;  %336 = vmatpush.xpose.msra.mxu3 %v85_v6 }
  0x29   :  { %99 = vmatpush.xpose.msra.mxu0 %v84_v7  ;;  %337 = vmatpush.xpose.msra.mxu1 %v84_v7 }
  0x2a   :  { %338 = vmatpush.xpose.msra.mxu2 %v84_v7  ;;  %339 = vmatpush.xpose.msra.mxu3 %v84_v7  ;;  %v452_v7 = vmov 0  }
  0x2d   :  { %100 = vmatpush.xpose.msra.mxu0 %v83_v8  ;;  %340 = vmatpush.xpose.msra.mxu1 %v83_v8 }
  0x2e   :  { %341 = vmatpush.xpose.msra.mxu2 %v83_v8  ;;  %342 = vmatpush.xpose.msra.mxu3 %v83_v8 }
  0x31   :  { %101 = vmatpush.xpose.msra.mxu0 %v82_v9  ;;  %343 = vmatpush.xpose.msra.mxu1 %v82_v9 }
  0x32   :  { %344 = vmatpush.xpose.msra.mxu2 %v82_v9  ;;  %345 = vmatpush.xpose.msra.mxu3 %v82_v9 }
  0x35   :  { %102 = vmatpush.xpose.msra.mxu0 %v81_v10  ;;  %346 = vmatpush.xpose.msra.mxu1 %v81_v10 }
  0x36   :  { %347 = vmatpush.xpose.msra.mxu2 %v81_v10  ;;  %348 = vmatpush.xpose.msra.mxu3 %v81_v10 }
  0x39   :  { %103 = vmatpush.xpose.msra.mxu0 %v80_v11  ;;  %349 = vmatpush.xpose.msra.mxu1 %v80_v11 }
  0x3a   :  { %350 = vmatpush.xpose.msra.mxu2 %v80_v11  ;;  %351 = vmatpush.xpose.msra.mxu3 %v80_v11 }
  0x3d   :  { %104 = vmatpush.xpose.msra.mxu0 %v79_v12  ;;  %352 = vmatpush.xpose.msra.mxu1 %v79_v12 }
  0x3e   :  { %353 = vmatpush.xpose.msra.mxu2 %v79_v12  ;;  %354 = vmatpush.xpose.msra.mxu3 %v79_v12 }
  0x41   :  { %105 = vmatpush.xpose.msra.mxu0 %v78_v13  ;;  %355 = vmatpush.xpose.msra.mxu1 %v78_v13 }
  0x42   :  { %356 = vmatpush.xpose.msra.mxu2 %v78_v13  ;;  %357 = vmatpush.xpose.msra.mxu3 %v78_v13 }
  0x45   :  { %106 = vmatpush.xpose.msra.mxu0 %v77_v14  ;;  %358 = vmatpush.xpose.msra.mxu1 %v77_v14 }
  0x46   :  { %359 = vmatpush.xpose.msra.mxu2 %v77_v14  ;;  %360 = vmatpush.xpose.msra.mxu3 %v77_v14 }
  0x49   :  { %107 = vmatpush.xpose.msra.mxu0 %v76_v15  ;;  %361 = vmatpush.xpose.msra.mxu1 %v76_v15 }
  0x4a   :  { %362 = vmatpush.xpose.msra.mxu2 %v76_v15  ;;  %363 = vmatpush.xpose.msra.mxu3 %v76_v15 }
  0x4c   :  { %108 = vmatmul.f32.vlgmr.msra.gmra.mxu0 %v44_v16  ;;  %132 = vmatmul.f32.vlgmr.msra.gmra.mxu1 %v52_v17 }
  0x4d   :  { %156 = vmatmul.f32.vlgmr.msra.gmra.mxu2 %v60_v18  ;;  %180 = vmatmul.f32.vlgmr.msra.gmra.mxu3 %v68_v22 }
  0x54   :  { %111 = vmatmul.f32.gmra.mxu0 %v45_v19  ;;  %135 = vmatmul.f32.gmra.mxu1 %v53_v20 }
  0x55   :  { %159 = vmatmul.f32.gmra.mxu2 %v61_v21  ;;  %183 = vmatmul.f32.gmra.mxu3 %v69_v26 }
  0x5c   :  { %114 = vmatmul.f32.gmra.mxu0 %v46_v23  ;;  %138 = vmatmul.f32.gmra.mxu1 %v54_v24 }
  0x5d   :  { %162 = vmatmul.f32.gmra.mxu2 %v62_v25  ;;  %186 = vmatmul.f32.gmra.mxu3 %v70_v30 }
  0x64   :  { %117 = vmatmul.f32.gmra.mxu0 %v47_v27  ;;  %141 = vmatmul.f32.gmra.mxu1 %v55_v28 }
  0x65   :  { %165 = vmatmul.f32.gmra.mxu2 %v63_v29  ;;  %189 = vmatmul.f32.gmra.mxu3 %v71_v34 }
  0x6c   :  { %120 = vmatmul.f32.gmra.mxu0 %v48_v31  ;;  %144 = vmatmul.f32.gmra.mxu1 %v56_v32 }
  0x6d   :  { %168 = vmatmul.f32.gmra.mxu2 %v64_v33  ;;  %192 = vmatmul.f32.gmra.mxu3 %v72_v38 }
  0x74   :  { %123 = vmatmul.f32.gmra.mxu0 %v49_v35  ;;  %147 = vmatmul.f32.gmra.mxu1 %v57_v36 }
  0x75   :  { %171 = vmatmul.f32.gmra.mxu2 %v65_v37  ;;  %195 = vmatmul.f32.gmra.mxu3 %v73_v42 }
  0x7c   :  { %126 = vmatmul.f32.gmra.mxu0 %v50_v39  ;;  %150 = vmatmul.f32.gmra.mxu1 %v58_v40 }
  0x7d   :  { %174 = vmatmul.f32.gmra.mxu2 %v66_v41  ;;  %198 = vmatmul.f32.gmra.mxu3 %v74_v46 }
  0x84   :  { %129 = vmatmul.f32.gmra.mxu0 %v51_v43  ;;  %153 = vmatmul.f32.gmra.mxu1 %v59_v44 }
  0x85   :  { %177 = vmatmul.f32.gmra.mxu2 %v67_v45  ;;  %201 = vmatmul.f32.gmra.mxu3 %v75_v47 }
  0xc9   :  { %v109_v48 = vpop.f32.mrf.mxu0  ;;  %v133_v49 = vpop.f32.mrf.mxu1 }
  0xd0   :  { %v475_v53 = vpop.f32.mrf.mxu2  ;;  %v479_v59 = vpop.f32.mrf.mxu3 }
  0xd1   :  { %v112_v50 = vpop.f32.mrf.mxu0  ;;  %v136_v51 = vpop.f32.mrf.mxu1 }
  0xd2   :  { %vm205_vm0 = vcmp.gt.f32.partialorder %v112_v50, %v109_v48  ;;  %v207_v0 = vmax.f32 %v109_v48, %v112_v50 }
  0xd3   :  { %v206_v8 = vsel %vm205_vm0, 1, %v452_v7 }
  0xd8   :  { %v477_v56 = vpop.f32.mrf.mxu2  ;;  %v483_v63 = vpop.f32.mrf.mxu3 }
  0xd9   :  { %v115_v52 = vpop.f32.mrf.mxu0  ;;  %v139_v54 = vpop.f32.mrf.mxu1 }
  0xda   :  { %v210_v1 = vmax.f32 %v207_v0, %v115_v52  ;;  %vm208_vm1 = vcmp.gt.f32.partialorder %v115_v52, %v207_v0 }
  0xdb   :  { %v209_v11 = vsel %vm208_vm1, 2, %v206_v8 }
  0xe0   :  { %v481_v60 = vpop.f32.mrf.mxu2  ;;  %v488_v10 = vpop.f32.mrf.mxu3 }
  0xe1   :  { %v118_v55 = vpop.f32.mrf.mxu0  ;;  %v142_v57 = vpop.f32.mrf.mxu1 }
  0xe2   :  { %v213_v3 = vmax.f32 %v210_v1, %v118_v55  ;;  %vm211_vm2 = vcmp.gt.f32.partialorder %v118_v55, %v210_v1 }
  0xe3   :  { %v212_v12 = vsel %vm211_vm2, 3, %v209_v11 }
  0xe8   :  { %v485_v2 = vpop.f32.mrf.mxu2  ;;  %v190_v26 = vpop.f32.mrf.mxu3 }
  0xe9   :  { %v121_v58 = vpop.f32.mrf.mxu0  ;;  %v145_v62 = vpop.f32.mrf.mxu1 }
  0xea   :  { %v216_v5 = vmax.f32 %v213_v3, %v121_v58  ;;  %vm214_vm3 = vcmp.gt.f32.partialorder %v121_v58, %v213_v3 }
  0xeb   :  { %v215_v13 = vsel %vm214_vm3, 4, %v212_v12 }
  0xf0   :  { %v169_v17 = vpop.f32.mrf.mxu2  ;;  %v193_v39 = vpop.f32.mrf.mxu3 }
  0xf1   :  { %v124_v61 = vpop.f32.mrf.mxu0  ;;  %v148_v6 = vpop.f32.mrf.mxu1 }
  0xf2   :  { %v219_v9 = vmax.f32 %v216_v5, %v124_v61  ;;  %vm217_vm4 = vcmp.gt.f32.partialorder %v124_v61, %v216_v5 }
  0xf3   :  { %v218_v15 = vsel %vm217_vm4, 5, %v215_v13 }
  0xf8   :  { %v172_v31 = vpop.f32.mrf.mxu2 }
  0xf9   :  { %v127_v4 = vpop.f32.mrf.mxu0  ;;  %v151_v23 = vpop.f32.mrf.mxu1 }
  0xfa   :  { %vm220_vm5 = vcmp.gt.f32.partialorder %v127_v4, %v219_v9  ;;  %v222_v14 = vmax.f32 %v219_v9, %v127_v4 }
  0xfb   :  { %v221_v18 = vsel %vm220_vm5, 6, %v218_v15 }
 0x100   :  { %v175_v44 = vpop.f32.mrf.mxu2 }
 0x101   :  { %v130_v16 = vpop.f32.mrf.mxu0  ;;  %v154_v36 = vpop.f32.mrf.mxu1 }
 0x102   :  { %vm223_vm6 = vcmp.gt.f32.partialorder %v130_v16, %v222_v14  ;;  %v225_v19 = vmax.f32 %v222_v14, %v130_v16 }
 0x103   :  { %v224_v20 = vsel %vm223_vm6, 7, %v221_v18 }
 0x104   :  { %vm226_vm7 = vcmp.gt.f32.partialorder %v133_v49, %v225_v19  ;;  %v228_v21 = vmax.f32 %v225_v19, %v133_v49 }
 0x105   :  { %v227_v22 = vsel %vm226_vm7, 8, %v224_v20 }
 0x106   :  { %vm229_vm8 = vcmp.gt.f32.partialorder %v136_v51, %v228_v21  ;;  %v231_v24 = vmax.f32 %v228_v21, %v136_v51  ;;  %v196_v51 = vpop.f32.mrf.mxu3 }
 0x107   :  { %v230_v25 = vsel %vm229_vm8, 9, %v227_v22 }
 0x108   :  { %vm232_vm9 = vcmp.gt.f32.partialorder %v139_v54, %v231_v24  ;;  %v234_v27 = vmax.f32 %v231_v24, %v139_v54 }
 0x109   :  { %v233_v28 = vsel %vm232_vm9, 10, %v230_v25 }
 0x10a   :  { %vm235_vm10 = vcmp.gt.f32.partialorder %v142_v57, %v234_v27  ;;  %v237_v29 = vmax.f32 %v234_v27, %v142_v57  ;;  %v178_v57 = vpop.f32.mrf.mxu2 }
 0x10b   :  { %v236_v30 = vsel %vm235_vm10, 11, %v233_v28 }
 0x10c   :  { %vm238_vm11 = vcmp.gt.f32.partialorder %v145_v62, %v237_v29  ;;  %v240_v32 = vmax.f32 %v237_v29, %v145_v62 }
 0x10d   :  { %v239_v33 = vsel %vm238_vm11, 12, %v236_v30 }
 0x10e   :  { %vm241_vm12 = vcmp.gt.f32.partialorder %v148_v6, %v240_v32  ;;  %v243_v34 = vmax.f32 %v240_v32, %v148_v6  ;;  %v199_v1 = vpop.f32.mrf.mxu3 }
 0x10f   :  { %v242_v35 = vsel %vm241_vm12, 13, %v239_v33 }
 0x110   :  { %vm244_vm13 = vcmp.gt.f32.partialorder %v151_v23, %v243_v34  ;;  %v246_v37 = vmax.f32 %v243_v34, %v151_v23 }
 0x111   :  { %v245_v38 = vsel %vm244_vm13, 14, %v242_v35 }
 0x112   :  { %vm247_vm14 = vcmp.gt.f32.partialorder %v154_v36, %v246_v37  ;;  %v249_v40 = vmax.f32 %v246_v37, %v154_v36 }
 0x113   :  { %v248_v41 = vsel %vm247_vm14, 15, %v245_v38 }
 0x114   :  { %vm250_vm15 = vcmp.gt.f32.partialorder %v475_v53, %v249_v40  ;;  %v252_v42 = vmax.f32 %v249_v40, %v475_v53 }
 0x115   :  { %v251_v43 = vsel %vm250_vm15, 16, %v248_v41 }
 0x116   :  { %vm253_vm0 = vcmp.gt.f32.partialorder %v477_v56, %v252_v42  ;;  %v255_v45 = vmax.f32 %v252_v42, %v477_v56  ;;  %v202_v12 = vpop.f32.mrf.mxu3 }
 0x117   :  { %v254_v46 = vsel %vm253_vm0, 17, %v251_v43 }
 0x118   :  { %vm256_vm1 = vcmp.gt.f32.partialorder %v481_v60, %v255_v45  ;;  %v258_v47 = vmax.f32 %v255_v45, %v481_v60 }
 0x119   :  { %v257_v48 = vsel %vm256_vm1, 18, %v254_v46 }
 0x11a   :  { %vm259_vm2 = vcmp.gt.f32.partialorder %v485_v2, %v258_v47  ;;  %v261_v49 = vmax.f32 %v258_v47, %v485_v2 }
 0x11b   :  { %v260_v50 = vsel %vm259_vm2, 19, %v257_v48 }
 0x11c   :  { %vm262_vm3 = vcmp.gt.f32.partialorder %v169_v17, %v261_v49  ;;  %v264_v52 = vmax.f32 %v261_v49, %v169_v17 }
 0x11d   :  { %v263_v53 = vsel %vm262_vm3, 20, %v260_v50 }
 0x11e   :  { %vm265_vm4 = vcmp.gt.f32.partialorder %v172_v31, %v264_v52  ;;  %v267_v54 = vmax.f32 %v264_v52, %v172_v31 }
 0x11f   :  { %v266_v55 = vsel %vm265_vm4, 21, %v263_v53 }
 0x120   :  { %vm268_vm5 = vcmp.gt.f32.partialorder %v175_v44, %v267_v54  ;;  %v270_v56 = vmax.f32 %v267_v54, %v175_v44 }
 0x121   :  { %v269_v58 = vsel %vm268_vm5, 22, %v266_v55 }
 0x122   :  { %vm271_vm6 = vcmp.gt.f32.partialorder %v178_v57, %v270_v56  ;;  %v273_v61 = vmax.f32 %v270_v56, %v178_v57 }
 0x123   :  { %v272_v60 = vsel %vm271_vm6, 23, %v269_v58 }
 0x124   :  { %vm274_vm7 = vcmp.gt.f32.partialorder %v479_v59, %v273_v61  ;;  %v276_v62 = vmax.f32 %v273_v61, %v479_v59 }
 0x125   :  { %v275_v0 = vsel %vm274_vm7, 24, %v272_v60 }
 0x126   :  { %vm277_vm8 = vcmp.gt.f32.partialorder %v483_v63, %v276_v62  ;;  %v279_v2 = vmax.f32 %v276_v62, %v483_v63 }
 0x127   :  { %v278_v3 = vsel %vm277_vm8, 25, %v275_v0 }
 0x128   :  { %vm280_vm9 = vcmp.gt.f32.partialorder %v488_v10, %v279_v2  ;;  %v282_v4 = vmax.f32 %v279_v2, %v488_v10 }
 0x129   :  { %v281_v5 = vsel %vm280_vm9, 26, %v278_v3 }
 0x12a   :  { %vm283_vm10 = vcmp.gt.f32.partialorder %v190_v26, %v282_v4  ;;  %v285_v6 = vmax.f32 %v282_v4, %v190_v26 }
 0x12b   :  { %v284_v7 = vsel %vm283_vm10, 27, %v281_v5 }
 0x12c   :  { %vm286_vm11 = vcmp.gt.f32.partialorder %v193_v39, %v285_v6  ;;  %v288_v8 = vmax.f32 %v285_v6, %v193_v39 }
 0x12d   :  { %v287_v9 = vsel %vm286_vm11, 28, %v284_v7 }
 0x12e   :  { %vm289_vm12 = vcmp.gt.f32.partialorder %v196_v51, %v288_v8  ;;  %v291_v59 = vmax.f32 %v288_v8, %v196_v51 }
 0x12f   :  { %v290_v11 = vsel %vm289_vm12, 29, %v287_v9 }
 0x130   :  { %vm292_vm13 = vcmp.gt.f32.partialorder %v199_v1, %v291_v59  ;;  %v294_v63 = vmax.f32 %v291_v59, %v199_v1 }
 0x131   :  { %v293_v10 = vsel %vm292_vm13, 30, %v290_v11 }
 0x132   :  { %vm295_vm14 = vcmp.gt.f32.partialorder %v202_v12, %v294_v63 }
 0x133   :  { %v296_v13 = vsel %vm295_vm14, 31, %v293_v10 }
 0x134   :  { %297 = vst [vmem:[#allocation7] sm:$0xff] %v296_v13 }
 0x135   :  { %308 = dma.vmem_to_hbm [thread:$0]  %s304_s1, 128, %s306_s23, [#allocation4]  }
 0x136   :  { %446 = dma.done.wait [#allocation4], 128  }
 0x137   :  { %447 = vsyncadd [#allocation4], 4294967168 }
 0x138   :  { %313 = vsyncpa [#allocation3], 1 }
 0x139   :  { %314 = vsyncpa [#allocation6], 1 }
 0x13a   :  { %315 = vsyncpa [#allocation4], 1 }

</bundles_post_ra>
